<compile_context>
chip_gen: v7x
topology: tpu7x:2x2x1
jax: 0.10.0
libtpu: 0.0.40
codegen_flags: <defaults>
</compile_context>

<pallas_src>
import functools

import jax
import jax.numpy as jnp
from jax.experimental import pallas as pl
from jax.experimental.pallas import tpu as pltpu

_HIGHEST = jax.lax.Precision.HIGHEST


def _round_up(x, m):
    return ((x + m - 1) // m) * m


# --------------------- operator composition (constant folding) ----------------
def compose_gcn_operator(supports, weight, bias, order):
    """Fold the whole GCN into one (Cout*V, Cin*V + 1) left-matmul operator.

    Rows are (out_channel, node) = o*V + w, columns are (in_channel, node) =
    c*V + v, plus a trailing bias column (paired with a ones-row on the input):

        y[(o,w), m] = sum_{c,v} G[(o,w),(c,v)] * x[(c,v), m] + bias[o]
        G = kron(W_0, I_V) + sum_{s, k=1..order} kron(W_{h(s,k)}, (A_s^T)^k)
    """
    S = len(supports)
    H = order * S + 1
    Cout = weight.shape[0]
    V = supports[0].shape[0]
    Cin = weight.shape[1] // H
    assert weight.shape[1] == H * Cin, (weight.shape, H, Cin)

    W = weight.astype(jnp.float32)
    eye_v = jnp.eye(V, dtype=jnp.float32)
    G = jnp.kron(W[:, :Cin], eye_v)                              # hop 0: identity
    h = 1
    for s in range(S):
        a_t = supports[s].T.astype(jnp.float32)
        ak = eye_v
        for _ in range(order):
            ak = jnp.matmul(a_t, ak, precision=_HIGHEST)          # (A_s^T)^k
            G = G + jnp.kron(W[:, h * Cin:(h + 1) * Cin], ak)
            h += 1
    b_col = jnp.repeat(bias.astype(jnp.float32), V).reshape(Cout * V, 1)
    return jnp.concatenate([G, b_col], axis=1)                    # (Cout*V, Cin*V+1)


# ------------------------------ Pallas kernel ---------------------------------
def _gcn_kernel(x_ref, g_ref, o_ref):
    """out_tile = G @ x_tile  (bf16 x bf16 -> f32 on the MXU)."""
    o_ref[...] = jnp.dot(g_ref[...], x_ref[...],
                         preferred_element_type=jnp.float32).astype(o_ref.dtype)


# ------------------------------ glue wrapper ----------------------------------
def gcn_pallas(x, supports, weight, bias, order=2):
    """GCN forward (eval mode).

    x       : (B, Cin, V, L)   NCHW activation (nodes = H, time = W)
    supports: list of (V, V)   adjacency matrices
    weight  : (Cout, (order*len(supports)+1)*Cin)  = Conv2d 1x1 weight[:, :, 0, 0]
    bias    : (Cout,)
    returns : (B, Cout, V, L)
    """
    B, Cin, V, L = x.shape
    S = len(supports)
    H = order * S + 1
    Cout = weight.shape[0]
    assert weight.shape[1] == H * Cin, (weight.shape, H, Cin)

    K = Cin * V + 1                      # contraction dim (+1 = ones-row for bias)
    N = Cout * V
    Kp = _round_up(K, 16)                # bf16 sublane packing
    Np = _round_up(N, 8)

    # The dense composed operator must fit in VMEM (single-buffered bf16).
    # TODO(synk): for realistic GWNET graphs (V~200, Cin=32) replace the dense
    # composed kron operator with a structured two-stage kernel ((V,V) node
    # diffusion + (Cout,Cin) channel projection); the dense G no longer fits.
    assert Np * Kp * 2 <= 24 * 1024 * 1024, "composed GCN operator too large for VMEM"

    # ----- lane tiling: rows=(c,v), lanes=(b,l) padded to a multiple of TM ----
    M = B * L
    if M <= 512:
        TM = _round_up(max(M, 1), 128)   # single lane-dense tile
    elif M <= 2048:
        TM = 256                         # >=2 tiles: feeds v7x's 2nd TC + pipeline
    else:
        TM = 512
    Mp = _round_up(M, TM)

    xr = jnp.transpose(x, (1, 2, 0, 3)).reshape(Cin * V, M).astype(jnp.float32)
    x_aug = jnp.concatenate([xr, jnp.ones((1, M), jnp.float32)], axis=0)
    x_aug = jnp.pad(x_aug, ((0, Kp - K), (0, Mp - M))).astype(jnp.bfloat16)

    g_aug = compose_gcn_operator(supports, weight, bias, order)       # (N, K) f32
    g_aug = jnp.pad(g_aug, ((0, Np - N), (0, Kp - K))).astype(jnp.bfloat16)

    # ----- VMEM budget: double-buffered tiles + single-buffered operator ------
    vmem_bytes = (2 * Kp * TM * 2        # x tile  (bf16, double-buffered)
                  + Np * Kp * 2          # G       (bf16, single-buffered)
                  + 2 * Np * TM * 4)     # out tile (f32, double-buffered)
    vmem_limit = min(48 * 1024 * 1024, 2 * vmem_bytes + 4 * 1024 * 1024)

    grid = (Mp // TM,)
    out = pl.pallas_call(
        _gcn_kernel,
        out_shape=jax.ShapeDtypeStruct((Np, Mp), jnp.float32),
        grid=grid,
        in_specs=[
            pl.BlockSpec((Kp, TM), lambda j: (0, j)),
            pl.BlockSpec((Np, Kp), lambda j: (0, 0),
                         pipeline_mode=pl.Buffered(1)),   # grid-invariant weights
        ],
        out_specs=pl.BlockSpec((Np, TM), lambda j: (0, j)),
        compiler_params=pltpu.CompilerParams(
            dimension_semantics=("parallel",),
            vmem_limit_bytes=vmem_limit),
    )(x_aug, g_aug)

    out = out[:N, :M].reshape(Cout, V, B, L)
    # TODO(synk): training-mode dropout not implemented (eval mode => identity).
    return jnp.transpose(out, (2, 0, 1, 3)).astype(x.dtype)


# --------------------------- pure-JAX f32 reference ---------------------------
def gcn_reference(x, supports, weight, bias, order=2):
    out = [x]
    for a in supports:
        x1 = jnp.einsum('ncvl,vw->ncwl', x, a, precision=_HIGHEST)
        out.append(x1)
        for _k in range(2, order + 1):
            x1 = jnp.einsum('ncvl,vw->ncwl', x1, a, precision=_HIGHEST)
            out.append(x1)
    h = jnp.concatenate(out, axis=1)
    y = jnp.einsum('oc,ncvl->novl', weight, h, precision=_HIGHEST)
    return y + bias[None, :, None, None]


# ---------------------------------- main ---------------------------------------
if __name__ == "__main__":
    key = jax.random.PRNGKey(0)
    kx, kw, kb, ka0, ka1, ka2 = jax.random.split(key, 6)

    # GWNET config: GCN(dilation_channels=8 -> residual_channels=8,
    #                   support_len=3, order=2), 8 graph nodes, 12 time steps.
    B, Cin, Cout, V, L = 2, 8, 8, 8, 12
    S, ORDER = 3, 2
    H = ORDER * S + 1

    x = jax.random.normal(kx, (B, Cin, V, L), jnp.float32)
    weight = 0.1 * jax.random.normal(kw, (Cout, H * Cin), jnp.float32)
    bias = 0.1 * jax.random.normal(kb, (Cout,), jnp.float32)

    supports = []
    for k in (ka0, ka1, ka2):   # row-normalized random adjacencies ("transition")
        a = jax.random.uniform(k, (V, V), jnp.float32) + 1e-3
        supports.append(a / jnp.sum(a, axis=1, keepdims=True))

    fwd = jax.jit(functools.partial(gcn_pallas, order=ORDER))
    y = jax.block_until_ready(fwd(x, supports, weight, bias))

    assert y.shape == (B, Cout, V, L), y.shape
    assert bool(jnp.all(jnp.isfinite(y)))

    # 1) Tight structural check: the identical bf16-quantized operands through a
    #    plain XLA f32 matmul -- validates layout / padding / bias fold exactly
    #    (only f32 accumulation order differs, ~1e-6).
    g_aug = compose_gcn_operator(supports, weight, bias, ORDER)
    xr = jnp.transpose(x, (1, 2, 0, 3)).reshape(Cin * V, B * L)
    x_aug = jnp.concatenate([xr, jnp.ones((1, B * L), jnp.float32)], axis=0)
    yq = jnp.matmul(g_aug.astype(jnp.bfloat16).astype(jnp.float32),
                    x_aug.astype(jnp.bfloat16).astype(jnp.float32),
                    precision=_HIGHEST)
    yq = jnp.transpose(yq.reshape(Cout, V, B, L), (2, 0, 1, 3))
    struct_err = float(jnp.max(jnp.abs(y - yq)))
    assert struct_err < 2e-3, f"structural error vs quantized reference: {struct_err}"

    # 2) Semantic check vs the exact f32 module reference; tolerance reflects
    #    the bf16 MXU inputs (expected max error ~1e-2 at these magnitudes).
    y_ref = gcn_reference(x, supports, weight, bias, order=ORDER)
    sem_err = float(jnp.max(jnp.abs(y - y_ref)))
    assert sem_err < 6e-2, f"max abs error vs f32 reference: {sem_err}"

    print("KERNEL_OK")
</pallas_src>

<mosaic_0001>
module attributes {stable_mosaic.version = 11 : i64} {
  func.func @_gcn_kernel(%arg0: i32, %arg1: memref<80x128xbf16, #tpu.memory_space<vmem>>, %arg2: memref<64x80xbf16, #tpu.memory_space<vmem>>, %arg3: memref<64x128xf32, #tpu.memory_space<vmem>>) attributes {dimension_semantics = [#tpu.dimension_semantics<parallel>], iteration_bounds = array<i64: 1>, scalar_prefetch = 0 : i64, scratch_operands = 0 : i64, tpu.core_type = #tpu.core_type<tc>, window_params = [{transform_indices = @transform_0, window_bounds = array<i64: 80, 128>}, {pipeline_mode = #tpu.pipeline_mode<synchronous>, transform_indices = @transform_1, window_bounds = array<i64: 64, 80>}, {transform_indices = @transform_2, window_bounds = array<i64: 64, 128>}]} {
    %c0 = arith.constant 0 : index
    %c0_0 = arith.constant 0 : index
    %0 = vector.load %arg2[%c0, %c0_0] : memref<64x80xbf16, #tpu.memory_space<vmem>>, vector<64x80xbf16>
    %c0_1 = arith.constant 0 : index
    %c0_2 = arith.constant 0 : index
    %1 = vector.load %arg1[%c0_1, %c0_2] : memref<80x128xbf16, #tpu.memory_space<vmem>>, vector<80x128xbf16>
    %cst = arith.constant dense<0.000000e+00> : vector<64x128xf32>
    %2 = tpu.matmul %0, %1, %cst {dimension_numbers = #tpu.dot_dimension_numbers<[1], [0], [0], [1], [0, 0, 1, 1], [], []>} : vector<64x80xbf16>, vector<80x128xbf16>, vector<64x128xf32> -> vector<64x128xf32>
    %c0_3 = arith.constant 0 : index
    %c0_4 = arith.constant 0 : index
    %3 = vector.load %arg3[%c0_3, %c0_4] : memref<64x128xf32, #tpu.memory_space<vmem>>, vector<64x128xf32>
    tpu.vector_store %arg3[%c0_3, %c0_4], %2 {strides = array<i32>} : memref<64x128xf32, #tpu.memory_space<vmem>>, vector<64x128xf32>,
    return
  }
  func.func @transform_0(%arg0: i32) -> (i32, i32) {
    %c0_i32 = arith.constant 0 : i32
    %c0_i32_0 = arith.constant 0 : i32
    return %c0_i32, %arg0 : i32, i32
  }
  func.func @transform_1(%arg0: i32) -> (i32, i32) {
    %c0_i32 = arith.constant 0 : i32
    %c0_i32_0 = arith.constant 0 : i32
    %c0_i32_1 = arith.constant 0 : i32
    return %c0_i32, %c0_i32_0 : i32, i32
  }
  func.func @transform_2(%arg0: i32) -> (i32, i32) {
    %c0_i32 = arith.constant 0 : i32
    %c0_i32_0 = arith.constant 0 : i32
    return %c0_i32, %arg0 : i32, i32
  }
}

</mosaic_0001>

<bundles_post_ra>
// kernel: gcn_pallas.1
= control target key start
LH: loop header
LB: loop body
LE: loop exit
PB: predicated region body
PF: predicated region fallthrough
CT: control target
= control target key end

     0   :  { %vm80_vm0 = vcmask 654336   ;;  %s299_s0 = inlined_call_operand.vmem [shape: bf16[80,128], index: 0, kind: input, shape index: {}]   ;;  %s300_s1 = inlined_call_operand.vmem [shape: bf16[64,80], index: 1, kind: input, shape index: {}]   ;;  %s301_s2 = inlined_call_operand.vmem [shape: f32[64,128], index: 2, kind: output, shape index: {}]  }
   0x1   :  { %v220_v0 = vld [vmem:[%s299_s0] sm:$0xff]   ;;  %v221_v1 = vld [vmem:[%s299_s0 + $0x8] sm:$0xff]   ;;  %v222_v2 = vld [vmem:[%s299_s0 + $0x10] sm:$0xff]  }
   0x2   :  { %192 = vmatprep.subr.bf16.mxu0 %v220_v0  ;;  %210 = vmatprep.subr.bf16.mxu1 %v220_v0  ;;  %v225_v3 = vld [vmem:[%s300_s1] sm:$0xff]   ;;  %v226_v4 = vld [vmem:[%s300_s1 + $0x10] sm:$0xff]   ;;  %v223_v5 = vld [vmem:[%s299_s0 + $0x18] sm:$0xff]  }
   0x3   :  { %193 = vmatpush3.bf16.msra.mxu0 %v220_v0  ;;  %215 = vmatpush3.bf16.msra.mxu1 %v220_v0  ;;  %v224_v6 = vld [vmem:[%s299_s0 + $0x20] sm:$0xff]   ;;  %v227_v7 = vld [vmem:[%s300_s1 + $0x8] sm:$0xff]   ;;  %v228_v8 = vld [vmem:[%s300_s1 + $0x18] sm:$0xff]  }
   0x4   :  { %194 = vmatprep.subr.bf16.mxu0 %v221_v1  ;;  %211 = vmatprep.subr.bf16.mxu1 %v221_v1 }
   0x5   :  { %202 = vmatprep.mubr.msk.bf16.mxu0 %vm80_vm0, %v225_v3  ;;  %206 = vmatprep.mubr.msk.bf16.mxu1 %vm80_vm0, %v226_v4 }
   0x7   :  { %195 = vmatpush3.bf16.msra.mxu0 %v221_v1  ;;  %216 = vmatpush3.bf16.msra.mxu1 %v221_v1 }
   0x8   :  { %196 = vmatprep.subr.bf16.mxu0 %v222_v2  ;;  %212 = vmatprep.subr.bf16.mxu1 %v222_v2 }
   0xb   :  { %197 = vmatpush3.bf16.msra.mxu0 %v222_v2  ;;  %217 = vmatpush3.bf16.msra.mxu1 %v222_v2 }
   0xc   :  { %198 = vmatprep.subr.bf16.mxu0 %v223_v5  ;;  %213 = vmatprep.subr.bf16.mxu1 %v223_v5 }
   0xf   :  { %199 = vmatpush3.bf16.msra.mxu0 %v223_v5  ;;  %218 = vmatpush3.bf16.msra.mxu1 %v223_v5 }
  0x10   :  { %200 = vmatprep.subr.bf16.mxu0 %v224_v6  ;;  %214 = vmatprep.subr.bf16.mxu1 %v224_v6 }
  0x13   :  { %201 = vmatpush3.bf16.msra.mxu0 %v224_v6  ;;  %219 = vmatpush3.bf16.msra.mxu1 %v224_v6 }
  0x16   :  { %203 = vmatmul.mubr.msk.bf16.vlgmr.msra.gmra.mrb[0].mxu0 %vm80_vm0, %v227_v7  ;;  %207 = vmatmul.mubr.msk.bf16.vlgmr.msra.gmra.mrb[0].mxu1 %vm80_vm0, %v228_v8 }
  0xe9   :  { %v204_v9 = vpop.f32.mrb[0].mxu0  ;;  %v208_v10 = vpop.f32.mrb[0].mxu1 }
  0xea   :  { %160 = vst [vmem:[%s301_s2 + $0x10] sm:$0xff] %v204_v9  ;;  %164 = vst [vmem:[%s301_s2 + $0x30] sm:$0xff] %v208_v10  ;;  %v127_v11 = vpop.f32.mrb[1].mxu0  ;;  %v143_v12 = vpop.f32.mrb[1].mxu1 }
  0xeb   :  { %158 = vst [vmem:[%s301_s2] sm:$0xff] %v127_v11  ;;  %162 = vst [vmem:[%s301_s2 + $0x20] sm:$0xff] %v143_v12  ;;  %v205_v13 = vpop.f32.mrb[2].mxu0  ;;  %v209_v14 = vpop.f32.mrb[2].mxu1 }
  0xec   :  { %161 = vst [vmem:[%s301_s2 + $0x18] sm:$0xff] %v205_v13  ;;  %165 = vst [vmem:[%s301_s2 + $0x38] sm:$0xff] %v209_v14  ;;  %v130_v15 = vpop.f32.mrb[3].mxu0  ;;  %v146_v16 = vpop.f32.mrb[3].mxu1 }
  0xed   :  { %159 = vst [vmem:[%s301_s2 + $0x8] sm:$0xff] %v130_v15  ;;  %163 = vst [vmem:[%s301_s2 + $0x28] sm:$0xff] %v146_v16 }

</bundles_post_ra>
